<compile_context>
chip_gen: v7x
topology: tpu7x:2x2x1
jax: 0.10.0
libtpu: 0.0.40
codegen_flags: <defaults>
</compile_context>

<pallas_src>
import functools

import jax
import jax.numpy as jnp
from jax import lax
from jax.experimental import pallas as pl
from jax.experimental.pallas import tpu as pltpu


def _round_up(x, m):
    return (x + m - 1) // m * m


def _spatial_attention_kernel(wmask_ref, x_ref, o_ref, *, C, NB, W, K, c_chunk):
    """Fused: channel mean/max -> KxK conv (2->1 ch) -> sigmoid -> x * att.

    wmask_ref : VMEM (2*K*K, HWp) f32; wmask[ci*K*K + ky*K + kx, p] =
                w[0, ci, ky, kx] * row_ok(ky, p) * col_ok(kx, p).
    x_ref     : VMEM (NB, C, HWp) input block (native dtype, lane-dense).
    o_ref     : VMEM (NB, C, HWp) output block.
    """
    HWp = x_ref.shape[-1]
    P = (K - 1) // 2
    n_full = C // c_chunk
    rem = C - n_full * c_chunk
    inv_c = 1.0 / C
    unroll = n_full if n_full <= 8 else 8       # static

    for img in range(NB):                       # NB is small and static
        # ---- Streaming channel sum/max with DENSE vreg accumulators. ----
        s0 = jnp.zeros((c_chunk, HWp), jnp.float32)
        m0 = jnp.full((c_chunk, HWp), -jnp.inf, jnp.float32)

        def _reduce_body(i, carry, _img=img):
            s, m = carry
            c0 = pl.multiple_of(i * c_chunk, c_chunk)
            blk = x_ref[_img, pl.ds(c0, c_chunk), :].astype(jnp.float32)
            return s + blk, jnp.maximum(m, blk)

        s_acc, m_acc = lax.fori_loop(0, n_full, _reduce_body, (s0, m0),
                                     unroll=unroll)
        # Single cross-sublane reduce after the loop (not per iteration).
        s = jnp.sum(s_acc, axis=0, keepdims=True)
        m = jnp.max(m_acc, axis=0, keepdims=True)
        if rem:
            blk = x_ref[img, pl.ds(n_full * c_chunk, rem), :].astype(jnp.float32)
            s = s + jnp.sum(blk, axis=0, keepdims=True)
            m = jnp.maximum(m, jnp.max(blk, axis=0, keepdims=True))

        avg_flat = s * inv_c                    # (1, HWp) f32
        max_flat = m                            # (1, HWp) f32

        # ---- KxK conv (2->1 ch): pltpu.roll + pre-weighted validity masks. ----
        acc = jnp.zeros((1, HWp), jnp.float32)
        for ci, flat in enumerate((avg_flat, max_flat)):
            for ky in range(K):
                for kx in range(K):
                    shift = (ky - P) * W + (kx - P)
                    tap = flat if shift == 0 else pltpu.roll(
                        flat, shift=(-shift) % HWp, axis=1)
                    row = ci * K * K + ky * K + kx
                    acc = acc + tap * wmask_ref[row:row + 1, :]

        att = jax.nn.sigmoid(acc).astype(o_ref.dtype)          # (1, HWp)
        # Hoisted sublane splat (broadcast_in_dim is not CSE'd by JAX).
        att_b = jnp.broadcast_to(att, (c_chunk, HWp))

        # ---- x * att : lane-dense, native-dtype multiply and store. ----
        def _mul_body(i, _, _img=img, _att=att_b):
            c0 = pl.multiple_of(i * c_chunk, c_chunk)
            o_ref[_img, pl.ds(c0, c_chunk), :] = (
                x_ref[_img, pl.ds(c0, c_chunk), :] * _att)
            return 0

        lax.fori_loop(0, n_full, _mul_body, 0, unroll=unroll)
        if rem:
            c0 = n_full * c_chunk
            o_ref[img, pl.ds(c0, rem), :] = (
                x_ref[img, pl.ds(c0, rem), :] * att_b[:rem, :])


def spatial_attention(x, w):
    """x: (N, C, H, W) NCHW;  w: (1, 2, K, K) OIHW conv weights (no bias)."""
    assert x.ndim == 4, f"Input tensor must have 4 dimensions, but got {x.shape}"
    N, C, H, W = x.shape
    assert C > 0, "Input tensor's channel dimension must be greater than 0"
    K = w.shape[-1]
    P = (K - 1) // 2
    HW = H * W
    HWp = _round_up(max(HW, 128), 128)          # lane-dense spatial axis
    itemsize = jnp.dtype(x.dtype).itemsize

    # ---- Pre-weighted per-tap masks: w[ci,ky,kx] * row_ok(ky) * col_ok(kx). ----
    pos = jnp.arange(HWp, dtype=jnp.int32)
    py, px = pos // W, pos % W
    dk = jnp.arange(K, dtype=jnp.int32) - P
    row_ok = ((py[None, :] + dk[:, None]) >= 0) & ((py[None, :] + dk[:, None]) < H)
    col_ok = ((px[None, :] + dk[:, None]) >= 0) & ((px[None, :] + dk[:, None]) < W)
    tap_ok = (row_ok[:, None, :] & col_ok[None, :, :]).astype(jnp.float32)  # (K,K,HWp)
    wmask = (w.reshape(2, K, K).astype(jnp.float32)[:, :, :, None]
             * tap_ok[None, :, :, :]).reshape(2 * K * K, HWp)

    # ---- Lane-dense flattened input (pad HW up to a multiple of 128). ----
    x_flat = x.reshape(N, C, HW)
    if HWp != HW:
        x_flat = jnp.pad(x_flat, ((0, 0), (0, 0), (0, HWp - HW)))

    # ---- Hardware-derived VMEM budget + per-step image batch NB. ----
    try:
        vmem_cap = int(pltpu.get_tpu_info().vmem_capacity_bytes)
    except Exception:  # conservative fallback
        vmem_cap = 64 * 1024 * 1024
    # ~40 MiB on 64-MiB parts (v7x), ~100 MiB on 128-MiB parts (v5e/v6e).
    vmem_limit = int(max(32 << 20, min(vmem_cap - (24 << 20), 100 << 20)))

    per_img = C * HWp * itemsize
    nb_cap = max(1, (vmem_limit // 2) // max(4 * per_img, 1))  # in+out, dbl-buffered
    nb_max = int(max(1, min(N, 8, nb_cap)))
    NB = 1
    for d in range(nb_max, 0, -1):              # largest exact divisor of N
        if N % d == 0:
            NB = d
            break

    # ---- dtype-aware channel chunk: full packed-vreg sublanes, f32
    #      accumulators kept register-sized (<= ~64 KiB each). ----
    sub = max(1, 32 // itemsize)                # 8 f32 / 16 bf16 / 32 int8
    reg_cap = max(1, (64 * 1024) // (HWp * 4))
    c_chunk = int(max(1, min(C, max(sub, min(64, reg_cap)))))

    kernel = functools.partial(_spatial_attention_kernel,
                               C=C, NB=NB, W=W, K=K, c_chunk=c_chunk)

    out_flat = pl.pallas_call(
        kernel,
        out_shape=jax.ShapeDtypeStruct((N, C, HWp), x.dtype),
        grid=(N // NB,),
        in_specs=[
            pl.BlockSpec((2 * K * K, HWp), lambda n: (0, 0)),     # weighted masks
            pl.BlockSpec((NB, C, HWp), lambda n: (n, 0, 0)),      # x
        ],
        out_specs=pl.BlockSpec((NB, C, HWp), lambda n: (n, 0, 0)),
        compiler_params=pltpu.CompilerParams(
            dimension_semantics=("parallel",),
            vmem_limit_bytes=vmem_limit),
    )(wmask, x_flat)

    if HWp != HW:
        out_flat = out_flat[:, :, :HW]
    return out_flat.reshape(N, C, H, W)


def _reference(x, w):
    """Pure-JAX reference matching the PyTorch forward."""
    avg = jnp.mean(x, axis=1, keepdims=True)
    mx = jnp.max(x, axis=1, keepdims=True)
    att = jnp.concatenate([avg, mx], axis=1)
    conv = lax.conv_general_dilated(
        att, w, window_strides=(1, 1), padding="SAME",
        dimension_numbers=("NCHW", "OIHW", "NCHW"))
    return x * jax.nn.sigmoid(conv)


if __name__ == "__main__":
    key = jax.random.PRNGKey(0)
    k_x, k_w = jax.random.split(key)

    N, C, H, W = 2, 4, 16, 16
    K = 3

    x = jax.random.normal(k_x, (N, C, H, W), jnp.float32)
    fan_in = 2 * K * K
    w = jax.random.normal(k_w, (1, 2, K, K), jnp.float32) * (1.0 / fan_in) ** 0.5

    out = spatial_attention(x, w)
    out = jax.block_until_ready(out)

    ref = _reference(x, w)
    assert out.shape == x.shape and out.dtype == x.dtype
    err = float(jnp.max(jnp.abs(out - ref)))
    assert jnp.allclose(out, ref, atol=1e-5, rtol=1e-5), err

    print("KERNEL_OK")
</pallas_src>

<mosaic_0001>
module attributes {stable_mosaic.version = 11 : i64} {
  func.func @_spatial_attention_kernel(%arg0: i32, %arg1: memref<18x256xf32, #tpu.memory_space<vmem>>, %arg2: memref<2x4x256xf32, #tpu.memory_space<vmem>>, %arg3: memref<2x4x256xf32, #tpu.memory_space<vmem>>) attributes {dimension_semantics = [#tpu.dimension_semantics<parallel>], iteration_bounds = array<i64: 1>, scalar_prefetch = 0 : i64, scratch_operands = 0 : i64, tpu.core_type = #tpu.core_type<tc>, window_params = [{pipeline_mode = #tpu.pipeline_mode<synchronous>, transform_indices = @transform_0, window_bounds = array<i64: 18, 256>}, {transform_indices = @transform_1, window_bounds = array<i64: 2, 4, 256>}, {transform_indices = @transform_2, window_bounds = array<i64: 2, 4, 256>}]} {
    %cst = arith.constant 0.000000e+00 : f32
    %0 = vector.broadcast %cst : f32 to vector<4x256xf32>
    %cst_0 = arith.constant 0xFF800000 : f32
    %1 = vector.broadcast %cst_0 : f32 to vector<4x256xf32>
    %c0_i32 = arith.constant 0 : i32
    %c4_i32 = arith.constant 4 : i32
    %2 = arith.muli %c0_i32, %c4_i32 : i32
    %3 = tpu.assume_multiple %2, 4 : i32
    %c0 = arith.constant 0 : index
    %4 = arith.index_cast %3 : i32 to index
    %c0_1 = arith.constant 0 : index
    %5 = vector.load %arg2[%c0, %4, %c0_1] : memref<2x4x256xf32, #tpu.memory_space<vmem>>, vector<1x4x256xf32>
    %6 = vector.shape_cast %5 : vector<1x4x256xf32> to vector<4x256xf32>
    %7 = arith.addf %0, %6 : vector<4x256xf32>
    %8 = arith.maximumf %1, %6 : vector<4x256xf32>
    %c1_i32 = arith.constant 1 : i32
    %cst_2 = arith.constant dense<0.000000e+00> : vector<256xf32>
    %9 = vector.multi_reduction <add>, %7, %cst_2 [0] : vector<4x256xf32> to vector<256xf32>
    %10 = vector.shape_cast %9 : vector<256xf32> to vector<1x256xf32>
    %cst_3 = arith.constant dense<0xFF800000> : vector<256xf32>
    %11 = vector.multi_reduction <maximumf>, %8, %cst_3 [0] : vector<4x256xf32> to vector<256xf32>
    %12 = vector.shape_cast %11 : vector<256xf32> to vector<1x256xf32>
    %cst_4 = arith.constant 2.500000e-01 : f32
    %13 = vector.broadcast %cst_4 : f32 to vector<1x256xf32>
    %14 = arith.mulf %10, %13 : vector<1x256xf32>
    %cst_5 = arith.constant 0.000000e+00 : f32
    %15 = vector.broadcast %cst_5 : f32 to vector<1x256xf32>
    %c17_i32 = arith.constant 17 : i32
    %16 = tpu.dynamic_rotate %14 by %c17_i32 dim 1 : vector<1x256xf32>, i32 -> vector<1x256xf32>
    %c0_6 = arith.constant 0 : index
    %c0_7 = arith.constant 0 : index
    %17 = vector.load %arg1[%c0_6, %c0_7] : memref<18x256xf32, #tpu.memory_space<vmem>>, vector<1x256xf32>
    %18 = arith.mulf %16, %17 : vector<1x256xf32>
    %19 = arith.addf %15, %18 : vector<1x256xf32>
    %c16_i32 = arith.constant 16 : i32
    %20 = tpu.dynamic_rotate %14 by %c16_i32 dim 1 : vector<1x256xf32>, i32 -> vector<1x256xf32>
    %c1 = arith.constant 1 : index
    %c0_8 = arith.constant 0 : index
    %21 = vector.load %arg1[%c1, %c0_8] : memref<18x256xf32, #tpu.memory_space<vmem>>, vector<1x256xf32>
    %22 = arith.mulf %20, %21 : vector<1x256xf32>
    %23 = arith.addf %19, %22 : vector<1x256xf32>
    %c15_i32 = arith.constant 15 : i32
    %24 = tpu.dynamic_rotate %14 by %c15_i32 dim 1 : vector<1x256xf32>, i32 -> vector<1x256xf32>
    %c2 = arith.constant 2 : index
    %c0_9 = arith.constant 0 : index
    %25 = vector.load %arg1[%c2, %c0_9] : memref<18x256xf32, #tpu.memory_space<vmem>>, vector<1x256xf32>
    %26 = arith.mulf %24, %25 : vector<1x256xf32>
    %27 = arith.addf %23, %26 : vector<1x256xf32>
    %c1_i32_10 = arith.constant 1 : i32
    %28 = tpu.dynamic_rotate %14 by %c1_i32_10 dim 1 : vector<1x256xf32>, i32 -> vector<1x256xf32>
    %c3 = arith.constant 3 : index
    %c0_11 = arith.constant 0 : index
    %29 = vector.load %arg1[%c3, %c0_11] : memref<18x256xf32, #tpu.memory_space<vmem>>, vector<1x256xf32>
    %30 = arith.mulf %28, %29 : vector<1x256xf32>
    %31 = arith.addf %27, %30 : vector<1x256xf32>
    %c4 = arith.constant 4 : index
    %c0_12 = arith.constant 0 : index
    %32 = vector.load %arg1[%c4, %c0_12] : memref<18x256xf32, #tpu.memory_space<vmem>>, vector<1x256xf32>
    %33 = arith.mulf %14, %32 : vector<1x256xf32>
    %34 = arith.addf %31, %33 : vector<1x256xf32>
    %c255_i32 = arith.constant 255 : i32
    %35 = tpu.dynamic_rotate %14 by %c255_i32 dim 1 : vector<1x256xf32>, i32 -> vector<1x256xf32>
    %c5 = arith.constant 5 : index
    %c0_13 = arith.constant 0 : index
    %36 = vector.load %arg1[%c5, %c0_13] : memref<18x256xf32, #tpu.memory_space<vmem>>, vector<1x256xf32>
    %37 = arith.mulf %35, %36 : vector<1x256xf32>
    %38 = arith.addf %34, %37 : vector<1x256xf32>
    %c241_i32 = arith.constant 241 : i32
    %39 = tpu.dynamic_rotate %14 by %c241_i32 dim 1 : vector<1x256xf32>, i32 -> vector<1x256xf32>
    %c6 = arith.constant 6 : index
    %c0_14 = arith.constant 0 : index
    %40 = vector.load %arg1[%c6, %c0_14] : memref<18x256xf32, #tpu.memory_space<vmem>>, vector<1x256xf32>
    %41 = arith.mulf %39, %40 : vector<1x256xf32>
    %42 = arith.addf %38, %41 : vector<1x256xf32>
    %c240_i32 = arith.constant 240 : i32
    %43 = tpu.dynamic_rotate %14 by %c240_i32 dim 1 : vector<1x256xf32>, i32 -> vector<1x256xf32>
    %c7 = arith.constant 7 : index
    %c0_15 = arith.constant 0 : index
    %44 = vector.load %arg1[%c7, %c0_15] : memref<18x256xf32, #tpu.memory_space<vmem>>, vector<1x256xf32>
    %45 = arith.mulf %43, %44 : vector<1x256xf32>
    %46 = arith.addf %42, %45 : vector<1x256xf32>
    %c239_i32 = arith.constant 239 : i32
    %47 = tpu.dynamic_rotate %14 by %c239_i32 dim 1 : vector<1x256xf32>, i32 -> vector<1x256xf32>
    %c8 = arith.constant 8 : index
    %c0_16 = arith.constant 0 : index
    %48 = vector.load %arg1[%c8, %c0_16] : memref<18x256xf32, #tpu.memory_space<vmem>>, vector<1x256xf32>
    %49 = arith.mulf %47, %48 : vector<1x256xf32>
    %50 = arith.addf %46, %49 : vector<1x256xf32>
    %c17_i32_17 = arith.constant 17 : i32
    %51 = tpu.dynamic_rotate %12 by %c17_i32_17 dim 1 : vector<1x256xf32>, i32 -> vector<1x256xf32>
    %c9 = arith.constant 9 : index
    %c0_18 = arith.constant 0 : index
    %52 = vector.load %arg1[%c9, %c0_18] : memref<18x256xf32, #tpu.memory_space<vmem>>, vector<1x256xf32>
    %53 = arith.mulf %51, %52 : vector<1x256xf32>
    %54 = arith.addf %50, %53 : vector<1x256xf32>
    %c16_i32_19 = arith.constant 16 : i32
    %55 = tpu.dynamic_rotate %12 by %c16_i32_19 dim 1 : vector<1x256xf32>, i32 -> vector<1x256xf32>
    %c10 = arith.constant 10 : index
    %c0_20 = arith.constant 0 : index
    %56 = vector.load %arg1[%c10, %c0_20] : memref<18x256xf32, #tpu.memory_space<vmem>>, vector<1x256xf32>
    %57 = arith.mulf %55, %56 : vector<1x256xf32>
    %58 = arith.addf %54, %57 : vector<1x256xf32>
    %c15_i32_21 = arith.constant 15 : i32
    %59 = tpu.dynamic_rotate %12 by %c15_i32_21 dim 1 : vector<1x256xf32>, i32 -> vector<1x256xf32>
    %c11 = arith.constant 11 : index
    %c0_22 = arith.constant 0 : index
    %60 = vector.load %arg1[%c11, %c0_22] : memref<18x256xf32, #tpu.memory_space<vmem>>, vector<1x256xf32>
    %61 = arith.mulf %59, %60 : vector<1x256xf32>
    %62 = arith.addf %58, %61 : vector<1x256xf32>
    %c1_i32_23 = arith.constant 1 : i32
    %63 = tpu.dynamic_rotate %12 by %c1_i32_23 dim 1 : vector<1x256xf32>, i32 -> vector<1x256xf32>
    %c12 = arith.constant 12 : index
    %c0_24 = arith.constant 0 : index
    %64 = vector.load %arg1[%c12, %c0_24] : memref<18x256xf32, #tpu.memory_space<vmem>>, vector<1x256xf32>
    %65 = arith.mulf %63, %64 : vector<1x256xf32>
    %66 = arith.addf %62, %65 : vector<1x256xf32>
    %c13 = arith.constant 13 : index
    %c0_25 = arith.constant 0 : index
    %67 = vector.load %arg1[%c13, %c0_25] : memref<18x256xf32, #tpu.memory_space<vmem>>, vector<1x256xf32>
    %68 = arith.mulf %12, %67 : vector<1x256xf32>
    %69 = arith.addf %66, %68 : vector<1x256xf32>
    %c255_i32_26 = arith.constant 255 : i32
    %70 = tpu.dynamic_rotate %12 by %c255_i32_26 dim 1 : vector<1x256xf32>, i32 -> vector<1x256xf32>
    %c14 = arith.constant 14 : index
    %c0_27 = arith.constant 0 : index
    %71 = vector.load %arg1[%c14, %c0_27] : memref<18x256xf32, #tpu.memory_space<vmem>>, vector<1x256xf32>
    %72 = arith.mulf %70, %71 : vector<1x256xf32>
    %73 = arith.addf %69, %72 : vector<1x256xf32>
    %c241_i32_28 = arith.constant 241 : i32
    %74 = tpu.dynamic_rotate %12 by %c241_i32_28 dim 1 : vector<1x256xf32>, i32 -> vector<1x256xf32>
    %c15 = arith.constant 15 : index
    %c0_29 = arith.constant 0 : index
    %75 = vector.load %arg1[%c15, %c0_29] : memref<18x256xf32, #tpu.memory_space<vmem>>, vector<1x256xf32>
    %76 = arith.mulf %74, %75 : vector<1x256xf32>
    %77 = arith.addf %73, %76 : vector<1x256xf32>
    %c240_i32_30 = arith.constant 240 : i32
    %78 = tpu.dynamic_rotate %12 by %c240_i32_30 dim 1 : vector<1x256xf32>, i32 -> vector<1x256xf32>
    %c16 = arith.constant 16 : index
    %c0_31 = arith.constant 0 : index
    %79 = vector.load %arg1[%c16, %c0_31] : memref<18x256xf32, #tpu.memory_space<vmem>>, vector<1x256xf32>
    %80 = arith.mulf %78, %79 : vector<1x256xf32>
    %81 = arith.addf %77, %80 : vector<1x256xf32>
    %c239_i32_32 = arith.constant 239 : i32
    %82 = tpu.dynamic_rotate %12 by %c239_i32_32 dim 1 : vector<1x256xf32>, i32 -> vector<1x256xf32>
    %c17 = arith.constant 17 : index
    %c0_33 = arith.constant 0 : index
    %83 = vector.load %arg1[%c17, %c0_33] : memref<18x256xf32, #tpu.memory_space<vmem>>, vector<1x256xf32>
    %84 = arith.mulf %82, %83 : vector<1x256xf32>
    %85 = arith.addf %81, %84 : vector<1x256xf32>
    %86 = arith.negf %85 : vector<1x256xf32>
    %87 = math.exp %86 : vector<1x256xf32>
    %cst_34 = arith.constant 1.000000e+00 : f32
    %88 = vector.broadcast %cst_34 : f32 to vector<1x256xf32>
    %89 = arith.addf %88, %87 : vector<1x256xf32>
    %90 = arith.divf %88, %89 : vector<1x256xf32>
    %91 = vector.shape_cast %90 : vector<1x256xf32> to vector<1x256xf32>
    %92 = vector.broadcast %91 : vector<1x256xf32> to vector<4x256xf32>
    %c0_i32_35 = arith.constant 0 : i32
    %c4_i32_36 = arith.constant 4 : i32
    %93 = arith.muli %c0_i32_35, %c4_i32_36 : i32
    %94 = tpu.assume_multiple %93, 4 : i32
    %c0_37 = arith.constant 0 : index
    %95 = arith.index_cast %94 : i32 to index
    %c0_38 = arith.constant 0 : index
    %96 = vector.load %arg2[%c0_37, %95, %c0_38] : memref<2x4x256xf32, #tpu.memory_space<vmem>>, vector<1x4x256xf32>
    %97 = vector.shape_cast %96 : vector<1x4x256xf32> to vector<4x256xf32>
    %98 = arith.mulf %97, %92 : vector<4x256xf32>
    %c0_39 = arith.constant 0 : index
    %99 = arith.index_cast %94 : i32 to index
    %c0_40 = arith.constant 0 : index
    %100 = vector.load %arg3[%c0_39, %99, %c0_40] : memref<2x4x256xf32, #tpu.memory_space<vmem>>, vector<1x4x256xf32>
    %101 = vector.shape_cast %100 : vector<1x4x256xf32> to vector<4x256xf32>
    %102 = vector.shape_cast %98 : vector<4x256xf32> to vector<1x4x256xf32>
    tpu.vector_store %arg3[%c0_39, %99, %c0_40], %102 {strides = array<i32>} : memref<2x4x256xf32, #tpu.memory_space<vmem>>, vector<1x4x256xf32>,
    %c1_i32_41 = arith.constant 1 : i32
    %cst_42 = arith.constant 0.000000e+00 : f32
    %103 = vector.broadcast %cst_42 : f32 to vector<4x256xf32>
    %cst_43 = arith.constant 0xFF800000 : f32
    %104 = vector.broadcast %cst_43 : f32 to vector<4x256xf32>
    %c0_i32_44 = arith.constant 0 : i32
    %c4_i32_45 = arith.constant 4 : i32
    %105 = arith.muli %c0_i32_44, %c4_i32_45 : i32
    %106 = tpu.assume_multiple %105, 4 : i32
    %c1_46 = arith.constant 1 : index
    %107 = arith.index_cast %106 : i32 to index
    %c0_47 = arith.constant 0 : index
    %108 = vector.load %arg2[%c1_46, %107, %c0_47] : memref<2x4x256xf32, #tpu.memory_space<vmem>>, vector<1x4x256xf32>
    %109 = vector.shape_cast %108 : vector<1x4x256xf32> to vector<4x256xf32>
    %110 = arith.addf %103, %109 : vector<4x256xf32>
    %111 = arith.maximumf %104, %109 : vector<4x256xf32>
    %c1_i32_48 = arith.constant 1 : i32
    %cst_49 = arith.constant dense<0.000000e+00> : vector<256xf32>
    %112 = vector.multi_reduction <add>, %110, %cst_49 [0] : vector<4x256xf32> to vector<256xf32>
    %113 = vector.shape_cast %112 : vector<256xf32> to vector<1x256xf32>
    %cst_50 = arith.constant dense<0xFF800000> : vector<256xf32>
    %114 = vector.multi_reduction <maximumf>, %111, %cst_50 [0] : vector<4x256xf32> to vector<256xf32>
    %115 = vector.shape_cast %114 : vector<256xf32> to vector<1x256xf32>
    %cst_51 = arith.constant 2.500000e-01 : f32
    %116 = vector.broadcast %cst_51 : f32 to vector<1x256xf32>
    %117 = arith.mulf %113, %116 : vector<1x256xf32>
    %cst_52 = arith.constant 0.000000e+00 : f32
    %118 = vector.broadcast %cst_52 : f32 to vector<1x256xf32>
    %c17_i32_53 = arith.constant 17 : i32
    %119 = tpu.dynamic_rotate %117 by %c17_i32_53 dim 1 : vector<1x256xf32>, i32 -> vector<1x256xf32>
    %c0_54 = arith.constant 0 : index
    %c0_55 = arith.constant 0 : index
    %120 = vector.load %arg1[%c0_54, %c0_55] : memref<18x256xf32, #tpu.memory_space<vmem>>, vector<1x256xf32>
    %121 = arith.mulf %119, %120 : vector<1x256xf32>
    %122 = arith.addf %118, %121 : vector<1x256xf32>
    %c16_i32_56 = arith.constant 16 : i32
    %123 = tpu.dynamic_rotate %117 by %c16_i32_56 dim 1 : vector<1x256xf32>, i32 -> vector<1x256xf32>
    %c1_57 = arith.constant 1 : index
    %c0_58 = arith.constant 0 : index
    %124 = vector.load %arg1[%c1_57, %c0_58] : memref<18x256xf32, #tpu.memory_space<vmem>>, vector<1x256xf32>
    %125 = arith.mulf %123, %124 : vector<1x256xf32>
    %126 = arith.addf %122, %125 : vector<1x256xf32>
    %c15_i32_59 = arith.constant 15 : i32
    %127 = tpu.dynamic_rotate %117 by %c15_i32_59 dim 1 : vector<1x256xf32>, i32 -> vector<1x256xf32>
    %c2_60 = arith.constant 2 : index
    %c0_61 = arith.constant 0 : index
    %128 = vector.load %arg1[%c2_60, %c0_61] : memref<18x256xf32, #tpu.memory_space<vmem>>, vector<1x256xf32>
    %129 = arith.mulf %127, %128 : vector<1x256xf32>
    %130 = arith.addf %126, %129 : vector<1x256xf32>
    %c1_i32_62 = arith.constant 1 : i32
    %131 = tpu.dynamic_rotate %117 by %c1_i32_62 dim 1 : vector<1x256xf32>, i32 -> vector<1x256xf32>
    %c3_63 = arith.constant 3 : index
    %c0_64 = arith.constant 0 : index
    %132 = vector.load %arg1[%c3_63, %c0_64] : memref<18x256xf32, #tpu.memory_space<vmem>>, vector<1x256xf32>
    %133 = arith.mulf %131, %132 : vector<1x256xf32>
    %134 = arith.addf %130, %133 : vector<1x256xf32>
    %c4_65 = arith.constant 4 : index
    %c0_66 = arith.constant 0 : index
    %135 = vector.load %arg1[%c4_65, %c0_66] : memref<18x256xf32, #tpu.memory_space<vmem>>, vector<1x256xf32>
    %136 = arith.mulf %117, %135 : vector<1x256xf32>
    %137 = arith.addf %134, %136 : vector<1x256xf32>
    %c255_i32_67 = arith.constant 255 : i32
    %138 = tpu.dynamic_rotate %117 by %c255_i32_67 dim 1 : vector<1x256xf32>, i32 -> vector<1x256xf32>
    %c5_68 = arith.constant 5 : index
    %c0_69 = arith.constant 0 : index
    %139 = vector.load %arg1[%c5_68, %c0_69] : memref<18x256xf32, #tpu.memory_space<vmem>>, vector<1x256xf32>
    %140 = arith.mulf %138, %139 : vector<1x256xf32>
    %141 = arith.addf %137, %140 : vector<1x256xf32>
    %c241_i32_70 = arith.constant 241 : i32
    %142 = tpu.dynamic_rotate %117 by %c241_i32_70 dim 1 : vector<1x256xf32>, i32 -> vector<1x256xf32>
    %c6_71 = arith.constant 6 : index
    %c0_72 = arith.constant 0 : index
    %143 = vector.load %arg1[%c6_71, %c0_72] : memref<18x256xf32, #tpu.memory_space<vmem>>, vector<1x256xf32>
    %144 = arith.mulf %142, %143 : vector<1x256xf32>
    %145 = arith.addf %141, %144 : vector<1x256xf32>
    %c240_i32_73 = arith.constant 240 : i32
    %146 = tpu.dynamic_rotate %117 by %c240_i32_73 dim 1 : vector<1x256xf32>, i32 -> vector<1x256xf32>
    %c7_74 = arith.constant 7 : index
    %c0_75 = arith.constant 0 : index
    %147 = vector.load %arg1[%c7_74, %c0_75] : memref<18x256xf32, #tpu.memory_space<vmem>>, vector<1x256xf32>
    %148 = arith.mulf %146, %147 : vector<1x256xf32>
    %149 = arith.addf %145, %148 : vector<1x256xf32>
    %c239_i32_76 = arith.constant 239 : i32
    %150 = tpu.dynamic_rotate %117 by %c239_i32_76 dim 1 : vector<1x256xf32>, i32 -> vector<1x256xf32>
    %c8_77 = arith.constant 8 : index
    %c0_78 = arith.constant 0 : index
    %151 = vector.load %arg1[%c8_77, %c0_78] : memref<18x256xf32, #tpu.memory_space<vmem>>, vector<1x256xf32>
    %152 = arith.mulf %150, %151 : vector<1x256xf32>
    %153 = arith.addf %149, %152 : vector<1x256xf32>
    %c17_i32_79 = arith.constant 17 : i32
    %154 = tpu.dynamic_rotate %115 by %c17_i32_79 dim 1 : vector<1x256xf32>, i32 -> vector<1x256xf32>
    %c9_80 = arith.constant 9 : index
    %c0_81 = arith.constant 0 : index
    %155 = vector.load %arg1[%c9_80, %c0_81] : memref<18x256xf32, #tpu.memory_space<vmem>>, vector<1x256xf32>
    %156 = arith.mulf %154, %155 : vector<1x256xf32>
    %157 = arith.addf %153, %156 : vector<1x256xf32>
    %c16_i32_82 = arith.constant 16 : i32
    %158 = tpu.dynamic_rotate %115 by %c16_i32_82 dim 1 : vector<1x256xf32>, i32 -> vector<1x256xf32>
    %c10_83 = arith.constant 10 : index
    %c0_84 = arith.constant 0 : index
    %159 = vector.load %arg1[%c10_83, %c0_84] : memref<18x256xf32, #tpu.memory_space<vmem>>, vector<1x256xf32>
    %160 = arith.mulf %158, %159 : vector<1x256xf32>
    %161 = arith.addf %157, %160 : vector<1x256xf32>
    %c15_i32_85 = arith.constant 15 : i32
    %162 = tpu.dynamic_rotate %115 by %c15_i32_85 dim 1 : vector<1x256xf32>, i32 -> vector<1x256xf32>
    %c11_86 = arith.constant 11 : index
    %c0_87 = arith.constant 0 : index
    %163 = vector.load %arg1[%c11_86, %c0_87] : memref<18x256xf32, #tpu.memory_space<vmem>>, vector<1x256xf32>
    %164 = arith.mulf %162, %163 : vector<1x256xf32>
    %165 = arith.addf %161, %164 : vector<1x256xf32>
    %c1_i32_88 = arith.constant 1 : i32
    %166 = tpu.dynamic_rotate %115 by %c1_i32_88 dim 1 : vector<1x256xf32>, i32 -> vector<1x256xf32>
    %c12_89 = arith.constant 12 : index
    %c0_90 = arith.constant 0 : index
    %167 = vector.load %arg1[%c12_89, %c0_90] : memref<18x256xf32, #tpu.memory_space<vmem>>, vector<1x256xf32>
    %168 = arith.mulf %166, %167 : vector<1x256xf32>
    %169 = arith.addf %165, %168 : vector<1x256xf32>
    %c13_91 = arith.constant 13 : index
    %c0_92 = arith.constant 0 : index
    %170 = vector.load %arg1[%c13_91, %c0_92] : memref<18x256xf32, #tpu.memory_space<vmem>>, vector<1x256xf32>
    %171 = arith.mulf %115, %170 : vector<1x256xf32>
    %172 = arith.addf %169, %171 : vector<1x256xf32>
    %c255_i32_93 = arith.constant 255 : i32
    %173 = tpu.dynamic_rotate %115 by %c255_i32_93 dim 1 : vector<1x256xf32>, i32 -> vector<1x256xf32>
    %c14_94 = arith.constant 14 : index
    %c0_95 = arith.constant 0 : index
    %174 = vector.load %arg1[%c14_94, %c0_95] : memref<18x256xf32, #tpu.memory_space<vmem>>, vector<1x256xf32>
    %175 = arith.mulf %173, %174 : vector<1x256xf32>
    %176 = arith.addf %172, %175 : vector<1x256xf32>
    %c241_i32_96 = arith.constant 241 : i32
    %177 = tpu.dynamic_rotate %115 by %c241_i32_96 dim 1 : vector<1x256xf32>, i32 -> vector<1x256xf32>
    %c15_97 = arith.constant 15 : index
    %c0_98 = arith.constant 0 : index
    %178 = vector.load %arg1[%c15_97, %c0_98] : memref<18x256xf32, #tpu.memory_space<vmem>>, vector<1x256xf32>
    %179 = arith.mulf %177, %178 : vector<1x256xf32>
    %180 = arith.addf %176, %179 : vector<1x256xf32>
    %c240_i32_99 = arith.constant 240 : i32
    %181 = tpu.dynamic_rotate %115 by %c240_i32_99 dim 1 : vector<1x256xf32>, i32 -> vector<1x256xf32>
    %c16_100 = arith.constant 16 : index
    %c0_101 = arith.constant 0 : index
    %182 = vector.load %arg1[%c16_100, %c0_101] : memref<18x256xf32, #tpu.memory_space<vmem>>, vector<1x256xf32>
    %183 = arith.mulf %181, %182 : vector<1x256xf32>
    %184 = arith.addf %180, %183 : vector<1x256xf32>
    %c239_i32_102 = arith.constant 239 : i32
    %185 = tpu.dynamic_rotate %115 by %c239_i32_102 dim 1 : vector<1x256xf32>, i32 -> vector<1x256xf32>
    %c17_103 = arith.constant 17 : index
    %c0_104 = arith.constant 0 : index
    %186 = vector.load %arg1[%c17_103, %c0_104] : memref<18x256xf32, #tpu.memory_space<vmem>>, vector<1x256xf32>
    %187 = arith.mulf %185, %186 : vector<1x256xf32>
    %188 = arith.addf %184, %187 : vector<1x256xf32>
    %189 = arith.negf %188 : vector<1x256xf32>
    %190 = math.exp %189 : vector<1x256xf32>
    %cst_105 = arith.constant 1.000000e+00 : f32
    %191 = vector.broadcast %cst_105 : f32 to vector<1x256xf32>
    %192 = arith.addf %191, %190 : vector<1x256xf32>
    %193 = arith.divf %191, %192 : vector<1x256xf32>
    %194 = vector.shape_cast %193 : vector<1x256xf32> to vector<1x256xf32>
    %195 = vector.broadcast %194 : vector<1x256xf32> to vector<4x256xf32>
    %c0_i32_106 = arith.constant 0 : i32
    %c4_i32_107 = arith.constant 4 : i32
    %196 = arith.muli %c0_i32_106, %c4_i32_107 : i32
    %197 = tpu.assume_multiple %196, 4 : i32
    %c1_108 = arith.constant 1 : index
    %198 = arith.index_cast %197 : i32 to index
    %c0_109 = arith.constant 0 : index
    %199 = vector.load %arg2[%c1_108, %198, %c0_109] : memref<2x4x256xf32, #tpu.memory_space<vmem>>, vector<1x4x256xf32>
    %200 = vector.shape_cast %199 : vector<1x4x256xf32> to vector<4x256xf32>
    %201 = arith.mulf %200, %195 : vector<4x256xf32>
    %c1_110 = arith.constant 1 : index
    %202 = arith.index_cast %197 : i32 to index
    %c0_111 = arith.constant 0 : index
    %203 = vector.load %arg3[%c1_110, %202, %c0_111] : memref<2x4x256xf32, #tpu.memory_space<vmem>>, vector<1x4x256xf32>
    %204 = vector.shape_cast %203 : vector<1x4x256xf32> to vector<4x256xf32>
    %205 = vector.shape_cast %201 : vector<4x256xf32> to vector<1x4x256xf32>
    tpu.vector_store %arg3[%c1_110, %202, %c0_111], %205 {strides = array<i32>} : memref<2x4x256xf32, #tpu.memory_space<vmem>>, vector<1x4x256xf32>,
    %c1_i32_112 = arith.constant 1 : i32
    return
  }
  func.func @transform_0(%arg0: i32) -> (i32, i32) {
    %c0_i32 = arith.constant 0 : i32
    %c0_i32_0 = arith.constant 0 : i32
    %c0_i32_1 = arith.constant 0 : i32
    return %c0_i32, %c0_i32_0 : i32, i32
  }
  func.func @transform_1(%arg0: i32) -> (i32, i32, i32) {
    %c0_i32 = arith.constant 0 : i32
    %c0_i32_0 = arith.constant 0 : i32
    %c0_i32_1 = arith.constant 0 : i32
    return %arg0, %c0_i32, %c0_i32_0 : i32, i32, i32
  }
  func.func @transform_2(%arg0: i32) -> (i32, i32, i32) {
    %c0_i32 = arith.constant 0 : i32
    %c0_i32_0 = arith.constant 0 : i32
    %c0_i32_1 = arith.constant 0 : i32
    return %arg0, %c0_i32, %c0_i32_0 : i32, i32, i32
  }
}

</mosaic_0001>

<bundles_post_ra>
// kernel: tpu_custom_call.1
= control target key start
LH: loop header
LB: loop body
LE: loop exit
PB: predicated region body
PF: predicated region fallthrough
CT: control target
= control target key end

     0   :  { %7 = vsyncpa [#allocation3], 0  ;;  %s1734_s0 = inlined_call_operand.hbm [shape: f32[18,256], index: 0, kind: input, shape index: {}]   ;;  %s1735_s1 = inlined_call_operand.hbm [shape: f32[2,4,256], index: 1, kind: input, shape index: {}]   ;;  %s1736_s2 = inlined_call_operand.hbm [shape: f32[2,4,256], index: 2, kind: output, shape index: {}]  }
   0x1   :  { %8 = vsyncpa [#allocation6], 0 }
   0x2   :  { %9 = vsyncpa [#allocation4], 0  ;;  %s1104_s9 = smov [#allocation2]   ;;  %s1032_s13 = scalar_lea.hbm %s1734_s0, 768 }
   0x3   :  { %s15_s10 = sshll.u32 %s1104_s9, 4  ;;  %p1033_p0 = scmp.ne.s32.totalorder %s1734_s0, %s1032_s13  ;;  %s16_s10 = int_to_ptr.vmem [resolvable:$true] %s15_s10 }
   0x4   :  { %p1036_p1 = scmp.lt.u32.totalorder %s1032_s13, %s1734_s0 }
   0x6   :  { %p1038_p2 = pnand %p1036_p1, %p1033_p0 }
   0x8   :  { %1041 = shalt.err (!%p1038_p2)
}
   0x9   :  { %s1042_s18 = scalar_lea.vmem %s16_s10, 768  ;;  %p1047_p4 = scmp.lt.s32.totalorder %s16_s10, %s16_s10 }
   0xa   :  { %p1043_p3 = scmp.ne.s32.totalorder %s16_s10, %s1042_s18  ;;  %p1048_p5 = scmp.lt.s32.totalorder %s1042_s18, %s1042_s18 }
   0xc   :  { %p1049_p6 = por %p1048_p5, %p1047_p4 }
   0xe   :  { %p1050_p7 = pnand %p1049_p6, %p1043_p3 }
  0x10   :  { %1053 = shalt.err (!%p1050_p7)
}
  0x11   :  { %s1105_s19 = smov 256   ;;  %s1106_s20 = smov 16  }
  0x12   :  { %21 = dma.hbm_to_vmem [thread:$0]  %s1734_s0, 768, %s16_s10, [#allocation3], %s1105_s19, %s1105_s19, %s1106_s20  }
  0x13   :  { %s1107_s23 = smov [#allocation5]   ;;  %s1054_s27 = scalar_lea.hbm %s1735_s1, 256 }
  0x14   :  { %s27_s24 = sshll.u32 %s1107_s23, 4  ;;  %p1055_p8 = scmp.ne.s32.totalorder %s1735_s1, %s1054_s27  ;;  %s28_s24 = int_to_ptr.vmem [resolvable:$true] %s27_s24 }
  0x15   :  { %p1058_p9 = scmp.lt.u32.totalorder %s1054_s27, %s1735_s1 }
  0x17   :  { %p1060_p10 = pnand %p1058_p9, %p1055_p8 }
  0x19   :  { %1063 = shalt.err (!%p1060_p10)
}
  0x1a   :  { %s1064_s4 = scalar_lea.vmem %s28_s24, 256  ;;  %p1069_p12 = scmp.lt.s32.totalorder %s28_s24, %s28_s24 }
  0x1b   :  { %p1065_p11 = scmp.ne.s32.totalorder %s28_s24, %s1064_s4  ;;  %p1070_p13 = scmp.lt.s32.totalorder %s1064_s4, %s1064_s4 }
  0x1d   :  { %p1071_p0 = por %p1070_p13, %p1069_p12 }
  0x1f   :  { %p1072_p1 = pnand %p1071_p0, %p1065_p11 }
  0x21   :  { %1075 = shalt.err (!%p1072_p1)
}
  0x22   :  { %s1108_s0 = smov 128   ;;  %s1109_s5 = smov 8  }
  0x23   :  { %33 = dma.hbm_to_vmem [thread:$0]  %s1735_s1, 256, %s28_s24, [#allocation6], %s1108_s0, %s1108_s0, %s1109_s5  }
  0x24   :  { %1098 = dma.done.wait [#allocation3], 768  }
  0x25   :  { %1099 = vsyncadd [#allocation3], 4294966528 }
  0x26   :  { %1100 = dma.done.wait [#allocation6], 256  }
  0x27   :  { %1101 = vsyncadd [#allocation6], 4294967040  ;;  %vm48_vm0 = vcmask 1043456   ;;  %v43_v0 = vld [vmem:[#allocation5] sm:$0xff]  ;;  %v1161_v1 = vld [vmem:[#allocation5 + $0x8] sm:$0xff]  ;;  %s1110_s1 = smov 17  }
  0x28   :  { %v49_v2 = vsel %vm48_vm0, %v43_v0, 0.0  ;;  %v529_v3 = vsel %vm48_vm0, %v1161_v1, 0.0  ;;  %v46_v4 = vcombine.high %v43_v0, %v43_v0  ;;  %v527_v5 = vcombine.high %v1161_v1, %v1161_v1  ;;  %s1111_s8 = smov 15   ;;  %s1112_s9 = smov 1  }
  0x29   :  { %v50_v6 = vrot.slane %v49_v2, 4  ;;  %v530_v7 = vrot.slane %v529_v3, 4  ;;  %s1113_s10 = smov 127   ;;  %v66_v37 = vsel %vm48_vm0, %v43_v0, -inf  ;;  %s1114_s11 = smov 113   ;;  %v546_v41 = vsel %vm48_vm0, %v1161_v1, -inf }
  0x2a   :  { %v56_v8 = vsel %vm48_vm0, %v46_v4, 0.0  ;;  %v536_v9 = vsel %vm48_vm0, %v527_v5, 0.0  ;;  %v73_v36 = vsel %vm48_vm0, %v46_v4, -inf  ;;  %v67_v39 = vrot.slane %v66_v37, 4  ;;  %s1115_s12 = smov 112   ;;  %s1116_s13 = smov 111  }
  0x2b   :  { %v51_v10 = vadd.f32 %v50_v6, %v49_v2  ;;  %v531_v11 = vadd.f32 %v530_v7, %v529_v3  ;;  %v57_v12 = vrot.slane %v56_v8, 4  ;;  %v537_v13 = vrot.slane %v536_v9, 4  ;;  %s1117_s14 = smov [#allocation7]  }
  0x2c   :  { %v74_v38 = vrot.slane %v73_v36, 4  ;;  %v553_v40 = vsel %vm48_vm0, %v527_v5, -inf  ;;  %v68_v43 = vmax.f32 %v66_v37, %v67_v39  ;;  %v547_v45 = vrot.slane %v546_v41, 4  ;;  %v139_v39 = vld [vmem:[#allocation2 + $0x2] ss:$8 sm:$0x3] }
  0x2d   :  { %v52_v14 = vrot.slane %v51_v10, 2  ;;  %v532_v15 = vrot.slane %v531_v11, 2  ;;  %v58_v16 = vadd.f32 %v57_v12, %v56_v8  ;;  %v538_v17 = vadd.f32 %v537_v13, %v536_v9  ;;  %v568_v9 = vld [vmem:[#allocation2] ss:$8 sm:$0x3]  ;;  %s979_s15 = sshll.u32 %s1117_s14, 4  ;;  %s980_s15 = int_to_ptr.vmem [resolvable:$true] %s979_s15 }
  0x2e   :  { %v75_v42 = vmax.f32 %v73_v36, %v74_v38  ;;  %v554_v44 = vrot.slane %v553_v40, 4  ;;  %v69_v47 = vrot.slane %v68_v43, 2  ;;  %v548_v49 = vmax.f32 %v546_v41, %v547_v45  ;;  %v163_v45 = vld [vmem:[#allocation2 + $0x3] ss:$8 sm:$0x3]  ;;  %s1076_s16 = scalar_lea.vmem %s980_s15, 256  ;;  %p1081_p3 = scmp.lt.s32.totalorder %s980_s15, %s980_s15 }
  0x2f   :  { %v53_v18 = vadd.f32 %v52_v14, %v51_v10  ;;  %v533_v19 = vadd.f32 %v532_v15, %v531_v11  ;;  %v59_v20 = vrot.slane %v58_v16, 2  ;;  %v539_v21 = vrot.slane %v538_v17, 2  ;;  %v590_v11 = vld [vmem:[#allocation2 + $0x1] ss:$8 sm:$0x3]  ;;  %p1077_p2 = scmp.ne.s32.totalorder %s980_s15, %s1076_s16  ;;  %p1082_p4 = scmp.lt.s32.totalorder %s1076_s16, %s1076_s16 }
  0x30   :  { %v76_v46 = vrot.slane %v75_v42, 2  ;;  %v555_v48 = vmax.f32 %v553_v40, %v554_v44  ;;  %v70_v51 = vmax.f32 %v68_v43, %v69_v47  ;;  %v549_v53 = vrot.slane %v548_v49, 2  ;;  %v91_v47 = vld [vmem:[#allocation2] ss:$8 sm:$0x3] }
  0x31   :  { %v54_v22 = vrot.slane %v53_v18, 1  ;;  %v534_v23 = vrot.slane %v533_v19, 1  ;;  %v60_v24 = vadd.f32 %v59_v20, %v58_v16  ;;  %v540_v25 = vadd.f32 %v539_v21, %v538_v17  ;;  %p1083_p5 = por %p1082_p4, %p1081_p3 }
  0x32   :  { %v77_v50 = vmax.f32 %v75_v42, %v76_v46  ;;  %v556_v52 = vrot.slane %v555_v48, 2  ;;  %v71_v55 = vrot.slane %v70_v51, 1  ;;  %v550_v57 = vmax.f32 %v548_v49, %v549_v53  ;;  %v180_v42 = vld [vmem:[#allocation2 + $0x4] ss:$8 sm:$0x3] }
  0x33   :  { %v55_v26 = vadd.f32 %v54_v22, %v53_v18  ;;  %v535_v27 = vadd.f32 %v534_v23, %v533_v19  ;;  %v61_v28 = vrot.slane %v60_v24, 1  ;;  %v541_v29 = vrot.slane %v540_v25, 1  ;;  %v634_v53 = vld [vmem:[#allocation2 + $0x3] ss:$8 sm:$0x3]  ;;  %p1084_p6 = pnand %p1083_p5, %p1077_p2 }
  0x34   :  { %v78_v54 = vrot.slane %v77_v50, 1  ;;  %v557_v56 = vmax.f32 %v555_v48, %v556_v52  ;;  %v1249_v59 = vmax.f32 %v70_v51, %v71_v55  ;;  %v551_v61 = vrot.slane %v550_v57, 1  ;;  %v650_v55 = vld [vmem:[#allocation2 + $0x4] ss:$8 sm:$0x3] }
  0x35   :  { %v1170_v30 = vmul.f32 0.25, %v55_v26  ;;  %v62_v31 = vadd.f32 %v61_v28, %v60_v24  ;;  %v1176_v32 = vmul.f32 0.25, %v535_v27  ;;  %v542_v34 = vadd.f32 %v541_v29, %v540_v25  ;;  %v612_v29 = vld [vmem:[#allocation2 + $0x2] ss:$8 sm:$0x3] }
  0x36   :  { %v1247_v58 = vmax.f32 %v77_v50, %v78_v54  ;;  %v558_v60 = vrot.slane %v557_v56, 1  ;;  %v1257_v63 = vmax.f32 %v550_v57, %v551_v61  ;;  %v86_v0 = vlaneseq }
  0x37   :  { %107 = vrot.lane.b32.xlu1 %v1170_v30, %s1106_s20  ;;  %82 = vrot.lane.b32.xlu0 %v1170_v30, %s1110_s1  ;;  %v1178_v33 = vmul.f32 0.25, %v62_v31  ;;  %v1184_v35 = vmul.f32 0.25, %v542_v34  ;;  %v115_v31 = vld [vmem:[#allocation2 + $0x1] ss:$8 sm:$0x3] }
  0x38   :  { %v1255_v62 = vmax.f32 %v557_v56, %v558_v60  ;;  %v1307_v1 = vand.u32 127, %v86_v0  ;;  %v94_v4 = vshrl.u32 %v86_v0, 7 }
  0x3a   :  { %vm111_vm1 = vcmp.lt.s32.totalorder %v1307_v1, 16  ;;  %vm88_vm2 = vcmp.lt.s32.totalorder %v1307_v1, 17  ;;  %v1329_v10 = vsub.s32 0, %v94_v4  ;;  %v1331_v12 = vsub.s32 1, %v94_v4 }
  0x3b   :  { %562 = vrot.lane.b32.xlu0 %v1176_v32, %s1110_s1  ;;  %109 = vrot.lane.b32.xlu1 %v1178_v33, %s1106_s20  ;;  %vm135_vm3 = vcmp.lt.s32.totalorder %v1307_v1, 15  ;;  %vm159_vm4 = vcmp.lt.s32.totalorder %v1307_v1, 1  ;;  %vm200_vm5 = vcmp.lt.s32.totalorder %v1307_v1, 127  ;;  %vm224_vm6 = vcmp.lt.s32.totalorder %v1307_v1, 113 }
  0x3c   :  { %v573_v15 = vrot.slane %v568_v9, %v1329_v10  ;;  %v577_v18 = vrot.slane %v568_v9, %v1331_v12  ;;  %v595_v19 = vrot.slane %v590_v11, %v1329_v10  ;;  %v599_v20 = vrot.slane %v590_v11, %v1331_v12 }
  0x3d   :  { %v617_v43 = vrot.slane %v612_v29, %v1329_v10  ;;  %v621_v44 = vrot.slane %v612_v29, %v1331_v12  ;;  %v120_v46 = vrot.slane %v115_v31, %v1329_v10  ;;  %v124_v48 = vrot.slane %v115_v31, %v1331_v12 }
  0x3e   :  { %v144_v49 = vrot.slane %v139_v39, %v1329_v10  ;;  %v148_v50 = vrot.slane %v139_v39, %v1331_v12  ;;  %v185_v54 = vrot.slane %v180_v42, %v1329_v10  ;;  %v168_v60 = vrot.slane %v163_v45, %v1329_v10 }
  0x3f   :  { %584 = vrot.lane.b32.xlu0 %v1176_v32, %s1106_s20  ;;  %564 = vrot.lane.b32.xlu1 %v1184_v35, %s1110_s1  ;;  %v172_v61 = vrot.slane %v163_v45, %v1331_v12  ;;  %v96_v4 = vrot.slane %v91_v47, %v1329_v10  ;;  %v643_v9 = vrot.slane %v634_v53, %v1331_v12  ;;  %vm248_vm7 = vcmp.lt.s32.totalorder %v1307_v1, 112 }
  0x40   :  { %v189_v11 = vrot.slane %v180_v42, %v1331_v12  ;;  %vm272_vm8 = vcmp.lt.s32.totalorder %v1307_v1, 111 }
  0x42   :  { %v193_v31 = vmul.f32 %v189_v11, %v1178_v33 }
  0x43   :  { %131 = vrot.lane.b32.xlu0 %v1170_v30, %s1111_s8  ;;  %586 = vrot.lane.b32.xlu1 %v1184_v35, %s1106_s20 }
  0x47   :  { %606 = vrot.lane.b32.xlu0 %v1176_v32, %s1111_s8  ;;  %133 = vrot.lane.b32.xlu1 %v1178_v33, %s1111_s8 }
  0x4b   :  { %155 = vrot.lane.b32.xlu0 %v1170_v30, %s1112_s9  ;;  %608 = vrot.lane.b32.xlu1 %v1184_v35, %s1111_s8 }
  0x4f   :  { %157 = vrot.lane.b32.xlu1 %v1178_v33, %s1112_s9  ;;  %84 = vrot.lane.b32.xlu0 %v1178_v33, %s1110_s1 }
  0x53   :  { %630 = vrot.lane.b32.xlu1 %v1184_v35, %s1112_s9  ;;  %628 = vrot.lane.b32.xlu0 %v1176_v32, %s1112_s9 }
  0x57   :  { %198 = vrot.lane.b32.xlu1 %v1178_v33, %s1113_s10  ;;  %196 = vrot.lane.b32.xlu0 %v1170_v30, %s1113_s10 }
  0x5b   :  { %668 = vrot.lane.b32.xlu1 %v1184_v35, %s1113_s10  ;;  %666 = vrot.lane.b32.xlu0 %v1176_v32, %s1113_s10 }
  0x5f   :  { %222 = vrot.lane.b32.xlu1 %v1178_v33, %s1114_s11  ;;  %220 = vrot.lane.b32.xlu0 %v1170_v30, %s1114_s11 }
  0x63   :  { %690 = vrot.lane.b32.xlu1 %v1184_v35, %s1114_s11  ;;  %688 = vrot.lane.b32.xlu0 %v1176_v32, %s1114_s11 }
  0x67   :  { %246 = vrot.lane.b32.xlu1 %v1178_v33, %s1115_s12  ;;  %244 = vrot.lane.b32.xlu0 %v1170_v30, %s1115_s12 }
  0x6b   :  { %712 = vrot.lane.b32.xlu1 %v1184_v35, %s1115_s12  ;;  %710 = vrot.lane.b32.xlu0 %v1176_v32, %s1115_s12 }
  0x6f   :  { %270 = vrot.lane.b32.xlu1 %v1178_v33, %s1116_s13  ;;  %268 = vrot.lane.b32.xlu0 %v1170_v30, %s1116_s13 }
  0x73   :  { %734 = vrot.lane.b32.xlu1 %v1184_v35, %s1116_s13  ;;  %732 = vrot.lane.b32.xlu0 %v1176_v32, %s1116_s13 }
  0x77   :  { %294 = vrot.lane.b32.xlu1 %v1247_v58, %s1110_s1  ;;  %292 = vrot.lane.b32.xlu0 %v1249_v59, %s1110_s1 }
  0x7b   :  { %756 = vrot.lane.b32.xlu1 %v1255_v62, %s1110_s1  ;;  %754 = vrot.lane.b32.xlu0 %v1257_v63, %s1110_s1 }
  0x7f   :  { %317 = vrot.lane.b32.xlu1 %v1247_v58, %s1106_s20  ;;  %315 = vrot.lane.b32.xlu0 %v1249_v59, %s1106_s20 }
  0x83   :  { %778 = vrot.lane.b32.xlu1 %v1255_v62, %s1106_s20  ;;  %776 = vrot.lane.b32.xlu0 %v1257_v63, %s1106_s20 }
  0x87   :  { %340 = vrot.lane.b32.xlu1 %v1247_v58, %s1111_s8  ;;  %338 = vrot.lane.b32.xlu0 %v1249_v59, %s1111_s8 }
  0x8b   :  { %800 = vrot.lane.b32.xlu1 %v1255_v62, %s1111_s8  ;;  %798 = vrot.lane.b32.xlu0 %v1257_v63, %s1111_s8 }
  0x8f   :  { %363 = vrot.lane.b32.xlu1 %v1247_v58, %s1112_s9  ;;  %361 = vrot.lane.b32.xlu0 %v1249_v59, %s1112_s9 }
  0x93   :  { %822 = vrot.lane.b32.xlu1 %v1255_v62, %s1112_s9  ;;  %820 = vrot.lane.b32.xlu0 %v1257_v63, %s1112_s9 }
  0x97   :  { %403 = vrot.lane.b32.xlu1 %v1247_v58, %s1113_s10  ;;  %401 = vrot.lane.b32.xlu0 %v1249_v59, %s1113_s10 }
  0x9b   :  { %860 = vrot.lane.b32.xlu1 %v1255_v62, %s1113_s10  ;;  %858 = vrot.lane.b32.xlu0 %v1257_v63, %s1113_s10 }
  0x9f   :  { %426 = vrot.lane.b32.xlu1 %v1247_v58, %s1114_s11  ;;  %424 = vrot.lane.b32.xlu0 %v1249_v59, %s1114_s11 }
  0xa3   :  { %882 = vrot.lane.b32.xlu1 %v1255_v62, %s1114_s11  ;;  %880 = vrot.lane.b32.xlu0 %v1257_v63, %s1114_s11 }
  0xa7   :  { %449 = vrot.lane.b32.xlu1 %v1247_v58, %s1115_s12  ;;  %447 = vrot.lane.b32.xlu0 %v1249_v59, %s1115_s12 }
  0xa9   :  { %v108_v2 = vpop.permute.xlu1 %107  ;;  %v1309_v3 = vpop.permute.xlu0 %82 }
  0xab   :  { %904 = vrot.lane.b32.xlu1 %v1255_v62, %s1115_s12  ;;  %902 = vrot.lane.b32.xlu0 %v1257_v63, %s1115_s12 }
  0xad   :  { %v563_v5 = vpop.permute.xlu0 %562  ;;  %v110_v6 = vpop.permute.xlu1 %109 }
  0xae   :  { %v1318_v7 = vsel %vm111_vm1, %v108_v2, %v110_v6  ;;  %v1322_v8 = vsel %vm111_vm1, %v110_v6, %v108_v2  ;;  %v639_v6 = vrot.slane %v634_v53, %v1329_v10 }
  0xaf   :  { %472 = vrot.lane.b32.xlu1 %v1247_v58, %s1116_s13  ;;  %470 = vrot.lane.b32.xlu0 %v1249_v59, %s1116_s13 }
  0xb1   :  { %v585_v13 = vpop.permute.xlu0 %584  ;;  %v565_v14 = vpop.permute.xlu1 %564 }
  0xb2   :  { %v566_v16 = vsel %vm88_vm2, %v563_v5, %v565_v14  ;;  %v567_v17 = vsel %vm88_vm2, %v565_v14, %v563_v5  ;;  %v100_v5 = vrot.slane %v91_v47, %v1331_v12 }
  0xb3   :  { %926 = vrot.lane.b32.xlu1 %v1255_v62, %s1116_s13  ;;  %924 = vrot.lane.b32.xlu0 %v1257_v63, %s1116_s13  ;;  %v580_v25 = vmul.f32 %v573_v15, %v567_v17  ;;  %v581_v26 = vmul.f32 %v577_v18, %v566_v16  ;;  %v192_v18 = vmul.f32 %v185_v54, %v1170_v30 }
  0xb4   :  { %v128_v30 = vmul.f32 %v124_v48, %v1318_v7  ;;  %v672_v48 = vld [vmem:[#allocation2 + $0x5] ss:$8 sm:$0x3] }
  0xb5   :  { %v132_v21 = vpop.permute.xlu0 %131  ;;  %v587_v22 = vpop.permute.xlu1 %586 }
  0xb6   :  { %v588_v23 = vsel %vm111_vm1, %v585_v13, %v587_v22  ;;  %v589_v24 = vsel %vm111_vm1, %v587_v22, %v585_v13  ;;  %v655_v13 = vrot.slane %v650_v55, %v1329_v10 }
  0xb7   :  { %v602_v27 = vmul.f32 %v595_v19, %v589_v24  ;;  %v603_v28 = vmul.f32 %v599_v20, %v588_v23  ;;  %v204_v19 = vld [vmem:[#allocation2 + $0x5] ss:$8 sm:$0x3]  ;;  %v659_v20 = vrot.slane %v650_v55, %v1331_v12 }
  0xb8   :  { %v213_v29 = vrot.slane %v204_v19, %v1331_v12  ;;  %v662_v33 = vmul.f32 %v655_v13, %v1176_v32 }
  0xb9   :  { %v604_v34 = vadd.f32 %v602_v27, %v580_v25  ;;  %v605_v36 = vadd.f32 %v603_v28, %v581_v26  ;;  %v607_v37 = vpop.permute.xlu0 %606  ;;  %v134_v38 = vpop.permute.xlu1 %133  ;;  %v127_v25 = vmul.f32 %v120_v46, %v1322_v8  ;;  %v209_v28 = vrot.slane %v204_v19, %v1329_v10 }
  0xba   :  { %v136_v40 = vsel %vm135_vm3, %v132_v21, %v134_v38  ;;  %v137_v41 = vsel %vm135_vm3, %v134_v38, %v132_v21 }
  0xbd   :  { %v156_v51 = vpop.permute.xlu0 %155  ;;  %v609_v52 = vpop.permute.xlu1 %608 }
  0xbe   :  { %v610_v56 = vsel %vm135_vm3, %v607_v37, %v609_v52  ;;  %v611_v57 = vsel %vm135_vm3, %v609_v52, %v607_v37 }
  0xbf   :  { %v624_v0 = vmul.f32 %v617_v43, %v611_v57  ;;  %v625_v2 = vmul.f32 %v621_v44, %v610_v56  ;;  %v677_v56 = vrot.slane %v672_v48, %v1329_v10  ;;  %v681_v57 = vrot.slane %v672_v48, %v1331_v12  ;;  %v1462_v48 = vld [vmem:[#allocation2 + $0x11] ss:$8 sm:$0x3] }
  0xc1   :  { %v626_v14 = vadd.f32 %v624_v0, %v604_v34  ;;  %v627_v15 = vadd.f32 %v625_v2, %v605_v36  ;;  %v158_v16 = vpop.permute.xlu1 %157  ;;  %v85_v17 = vpop.permute.xlu0 %84  ;;  %v151_v34 = vmul.f32 %v144_v49, %v137_v41  ;;  %v152_v36 = vmul.f32 %v148_v50, %v136_v40 }
  0xc2   :  { %v160_v21 = vsel %vm159_vm4, %v156_v51, %v158_v16  ;;  %v161_v22 = vsel %vm159_vm4, %v158_v16, %v156_v51  ;;  %v89_v23 = vsel %vm88_vm2, %v1309_v3, %v85_v17  ;;  %v90_v24 = vsel %vm88_vm2, %v85_v17, %v1309_v3 }
  0xc3   :  { %v103_v26 = vmul.f32 %v96_v4, %v90_v24  ;;  %v104_v27 = vmul.f32 %v100_v5, %v89_v23  ;;  %v175_v42 = vmul.f32 %v168_v60, %v161_v22  ;;  %v176_v8 = vmul.f32 %v172_v61, %v160_v21 }
  0xc4   :  { %v663_v40 = vmul.f32 %v659_v20, %v1184_v35 }
  0xc5   :  { %v129_v37 = vadd.f32 %v127_v25, %v103_v26  ;;  %v130_v38 = vadd.f32 %v128_v30, %v104_v27  ;;  %v631_v39 = vpop.permute.xlu1 %630  ;;  %v629_v3 = vpop.permute.xlu0 %628 }
  0xc6   :  { %v632_v7 = vsel %vm159_vm4, %v629_v3, %v631_v39  ;;  %v633_v43 = vsel %vm159_vm4, %v631_v39, %v629_v3 }
  0xc7   :  { %v153_v44 = vadd.f32 %v151_v34, %v129_v37  ;;  %v154_v45 = vadd.f32 %v152_v36, %v130_v38  ;;  %v646_v46 = vmul.f32 %v639_v6, %v633_v43  ;;  %v647_v47 = vmul.f32 %v643_v9, %v632_v7  ;;  %v1434_v34 = vld [vmem:[#allocation2 + $0x7] ss:$8 sm:$0x3]  ;;  %v1440_v37 = vld [vmem:[#allocation2 + $0x10] ss:$8 sm:$0x3] }
  0xc8   :  { %v1436_v36 = vld [vmem:[#allocation2 + $0x7] ss:$8 sm:$0x3]  ;;  %v1450_v7 = vld [vmem:[#allocation2 + $0x11] ss:$8 sm:$0x3] }
  0xc9   :  { %v648_v41 = vadd.f32 %v646_v46, %v626_v14  ;;  %v649_v49 = vadd.f32 %v647_v47, %v627_v15  ;;  %v199_v50 = vpop.permute.xlu1 %198  ;;  %v177_v51 = vadd.f32 %v175_v42, %v153_v44  ;;  %v178_v52 = vadd.f32 %v176_v8, %v154_v45  ;;  %v197_v53 = vpop.permute.xlu0 %196  ;;  %v1446_v42 = vld [vmem:[#allocation2 + $0x10] ss:$8 sm:$0x3] }
  0xca   :  { %v201_v54 = vsel %vm200_vm5, %v197_v53, %v199_v50  ;;  %v202_v55 = vsel %vm200_vm5, %v199_v50, %v197_v53  ;;  %v257_v45 = vrot.slane %v1434_v34, %v1329_v10  ;;  %v261_v46 = vrot.slane %v1434_v34, %v1331_v12  ;;  %v1473_v50 = vld [vmem:[#allocation2 + $0x12] ss:$8 sm:$0x3]  ;;  %v1511_v34 = vld [vmem:[#allocation2 + $0x14] ss:$8 sm:$0x3] }
  0xcb   :  { %v194_v60 = vadd.f32 %v192_v18, %v177_v51  ;;  %v195_v32 = vadd.f32 %v193_v31, %v178_v52  ;;  %v216_v61 = vmul.f32 %v209_v28, %v201_v54  ;;  %v217_v35 = vmul.f32 %v213_v29, %v202_v55  ;;  %v228_v29 = vld [vmem:[#allocation2 + $0x6] ss:$8 sm:$0x3]  ;;  %v1483_v55 = vld [vmem:[#allocation2 + $0x13] ss:$8 sm:$0x3] }
  0xcc   :  { %v664_v0 = vadd.f32 %v662_v33, %v648_v41  ;;  %v665_v2 = vadd.f32 %v663_v40, %v649_v49  ;;  %v1432_v31 = vld [vmem:[#allocation2 + $0x6] ss:$8 sm:$0x3]  ;;  %v233_v38 = vrot.slane %v228_v29, %v1329_v10  ;;  %v237_v39 = vrot.slane %v228_v29, %v1331_v12  ;;  %v1464_v33 = vld [vmem:[#allocation2 + $0x12] ss:$8 sm:$0x3] }
  0xcd   :  { %v1404_v4 = vadd.f32 %v216_v61, %v194_v60  ;;  %v1406_v5 = vadd.f32 %v217_v35, %v195_v32  ;;  %v669_v6 = vpop.permute.xlu1 %668  ;;  %v667_v9 = vpop.permute.xlu0 %666  ;;  %v699_v3 = vrot.slane %v1432_v31, %v1329_v10  ;;  %v703_v44 = vrot.slane %v1432_v31, %v1331_v12 }
  0xce   :  { %v670_v11 = vsel %vm200_vm5, %v667_v9, %v669_v6  ;;  %v671_v13 = vsel %vm200_vm5, %v669_v6, %v667_v9  ;;  %v721_v47 = vrot.slane %v1436_v36, %v1329_v10  ;;  %v725_v40 = vrot.slane %v1436_v36, %v1331_v12 }
  0xcf   :  { %v684_v14 = vmul.f32 %v677_v56, %v670_v11  ;;  %v685_v15 = vmul.f32 %v681_v57, %v671_v13  ;;  %v281_v41 = vrot.slane %v1440_v37, %v1329_v10  ;;  %v285_v49 = vrot.slane %v1440_v37, %v1331_v12  ;;  %v1485_v56 = vld [vmem:[#allocation2 + $0x13] ss:$8 sm:$0x3] }
  0xd0   :  { %v743_v51 = vrot.slane %v1446_v42, %v1329_v10  ;;  %v747_v52 = vrot.slane %v1446_v42, %v1331_v12  ;;  %v304_v53 = vrot.slane %v1450_v7, %v1329_v10  ;;  %v308_v54 = vrot.slane %v1450_v7, %v1331_v12 }
  0xd1   :  { %v1412_v16 = vadd.f32 %v684_v14, %v664_v0  ;;  %v1414_v17 = vadd.f32 %v685_v15, %v665_v2  ;;  %v223_v18 = vpop.permute.xlu1 %222  ;;  %v221_v19 = vpop.permute.xlu0 %220  ;;  %v765_v60 = vrot.slane %v1462_v48, %v1329_v10  ;;  %v769_v32 = vrot.slane %v1462_v48, %v1331_v12  ;;  %v385_v2 = vld [vmem:[#allocation2 + $0x15] ss:$8 sm:$0x3] }
  0xd2   :  { %v327_v35 = vrot.slane %v1464_v33, %v1329_v10  ;;  %v225_v6 = vsel %vm224_vm6, %v221_v19, %v223_v18  ;;  %v226_v9 = vsel %vm224_vm6, %v223_v18, %v221_v19  ;;  %v1513_v18 = vld [vmem:[#allocation2 + $0x14] ss:$8 sm:$0x3]  ;;  %v390_v37 = vrot.slane %v385_v2, %v1329_v10 }
  0xd3   :  { %v394_v13 = vrot.slane %v385_v2, %v1331_v12  ;;  %v240_v11 = vmul.f32 %v233_v38, %v225_v6  ;;  %v241_v15 = vmul.f32 %v237_v39, %v226_v9 }
  0xd5   :  { %v691_v20 = vpop.permute.xlu1 %690  ;;  %v689_v21 = vpop.permute.xlu0 %688 }
  0xd6   :  { %v692_v19 = vsel %vm224_vm6, %v689_v21, %v691_v20  ;;  %v693_v36 = vsel %vm224_vm6, %v691_v20, %v689_v21  ;;  %v373_v20 = vrot.slane %v1511_v34, %v1329_v10 }
  0xd7   :  { %v706_v2 = vmul.f32 %v699_v3, %v692_v19  ;;  %v707_v6 = vmul.f32 %v703_v44, %v693_v36  ;;  %v242_v44 = vadd.f32 %v240_v11, %v1404_v4  ;;  %v243_v19 = vadd.f32 %v241_v15, %v1406_v5 }
  0xd9   :  { %v1416_v22 = vpop.permute.xlu1 %246  ;;  %v1418_v23 = vpop.permute.xlu0 %244 }
  0xda   :  { %v249_v31 = vsel %vm248_vm7, %v1418_v23, %v1416_v22  ;;  %v250_v29 = vsel %vm248_vm7, %v1416_v22, %v1418_v23 }
  0xdb   :  { %v264_v9 = vmul.f32 %v257_v45, %v249_v31  ;;  %v265_v21 = vmul.f32 %v261_v46, %v250_v29 }
  0xdd   :  { %v1420_v24 = vpop.permute.xlu1 %712  ;;  %v1422_v25 = vpop.permute.xlu0 %710  ;;  %v267_v11 = vadd.f32 %v265_v21, %v243_v19  ;;  %v842_v21 = vld [vmem:[#allocation2 + $0x15] ss:$8 sm:$0x3] }
  0xde   :  { %v714_v22 = vsel %vm248_vm7, %v1422_v25, %v1420_v24  ;;  %v715_v23 = vsel %vm248_vm7, %v1420_v24, %v1422_v25  ;;  %v1556_v24 = vmul.f32 %v390_v37, %v1249_v59  ;;  %v1559_v25 = vmul.f32 %v394_v13, %v1247_v58 }
  0xdf   :  { %v728_v45 = vmul.f32 %v721_v47, %v714_v22  ;;  %v729_v46 = vmul.f32 %v725_v40, %v715_v23  ;;  %v709_v47 = vadd.f32 %v707_v6, %v1414_v17  ;;  %v266_v40 = vadd.f32 %v264_v9, %v242_v44 }
  0xe0   :  { %v1740_v44 = vrot.slane %v1473_v50, %v1329_v10 }
  0xe1   :  { %v1424_v30 = vpop.permute.xlu1 %270  ;;  %v1426_v26 = vpop.permute.xlu0 %268  ;;  %v731_v13 = vadd.f32 %v729_v46, %v709_v47  ;;  %v847_v46 = vrot.slane %v842_v21, %v1329_v10 }
  0xe2   :  { %v273_v38 = vsel %vm272_vm8, %v1426_v26, %v1424_v30  ;;  %v274_v3 = vsel %vm272_vm8, %v1424_v30, %v1426_v26  ;;  %v708_v26 = vadd.f32 %v706_v2, %v1412_v16 }
  0xe3   :  { %v288_v5 = vmul.f32 %v281_v41, %v273_v38  ;;  %v289_v30 = vmul.f32 %v285_v49, %v274_v3 }
  0xe5   :  { %v1428_v27 = vpop.permute.xlu1 %734  ;;  %v1430_v28 = vpop.permute.xlu0 %732  ;;  %v290_v15 = vadd.f32 %v288_v5, %v266_v40  ;;  %v1743_v40 = vrot.slane %v1485_v56, %v1331_v12 }
  0xe6   :  { %v736_v29 = vsel %vm272_vm8, %v1430_v28, %v1428_v27  ;;  %v737_v4 = vsel %vm272_vm8, %v1428_v27, %v1430_v28 }
  0xe7   :  { %v750_v27 = vmul.f32 %v743_v51, %v736_v29  ;;  %v751_v28 = vmul.f32 %v747_v52, %v737_v4  ;;  %v730_v52 = vadd.f32 %v728_v45, %v708_v26  ;;  %v851_v29 = vrot.slane %v842_v21, %v1331_v12 }
  0xe8   :  { %v1742_v26 = vrot.slane %v1485_v56, %v1329_v10 }
  0xe9   :  { %v1448_v8 = vpop.permute.xlu1 %294  ;;  %v1452_v43 = vpop.permute.xlu0 %292  ;;  %v752_v38 = vadd.f32 %v750_v27, %v730_v52  ;;  %v753_v2 = vadd.f32 %v751_v28, %v731_v13  ;;  %v854_v13 = vmul.f32 %v847_v46, %v1257_v63  ;;  %v454_v46 = vld [vmem:[#allocation2 + $0x20] ss:$8 sm:$0x3] }
  0xea   :  { %v296_v58 = vsel %vm88_vm2, %v1452_v43, %v1448_v8  ;;  %v297_v59 = vsel %vm88_vm2, %v1448_v8, %v1452_v43 }
  0xeb   :  { %v311_v17 = vmul.f32 %v304_v53, %v297_v59  ;;  %v312_v49 = vmul.f32 %v308_v54, %v296_v58 }
  0xed   :  { %v757_v57 = vpop.permute.xlu1 %756  ;;  %v755_v61 = vpop.permute.xlu0 %754  ;;  %v313_v6 = vadd.f32 %v311_v17, %v290_v15  ;;  %v855_v15 = vmul.f32 %v851_v29, %v1255_v62  ;;  %v908_v29 = vld [vmem:[#allocation2 + $0x20] ss:$8 sm:$0x3] }
  0xee   :  { %v758_v41 = vsel %vm88_vm2, %v755_v61, %v757_v57  ;;  %v759_v8 = vsel %vm88_vm2, %v757_v57, %v755_v61  ;;  %v291_v57 = vadd.f32 %v289_v30, %v267_v11 }
  0xef   :  { %v772_v61 = vmul.f32 %v765_v60, %v759_v8  ;;  %v773_v53 = vmul.f32 %v769_v32, %v758_v41 }
  0xf0   :  { %v314_v22 = vadd.f32 %v312_v49, %v291_v57 }
  0xf1   :  { %v318_v14 = vpop.permute.xlu1 %317  ;;  %v316_v0 = vpop.permute.xlu0 %315  ;;  %v775_v4 = vadd.f32 %v773_v53, %v753_v2 }
  0xf2   :  { %v319_v42 = vsel %vm111_vm1, %v316_v0, %v318_v14  ;;  %v320_v51 = vsel %vm111_vm1, %v318_v14, %v316_v0  ;;  %v1737_v14 = vrot.slane %v1464_v33, %v1331_v12  ;;  %v1739_v33 = vrot.slane %v1483_v55, %v1331_v12 }
  0xf3   :  { %v334_v0 = vmul.f32 %v327_v35, %v320_v51  ;;  %v1738_v35 = vrot.slane %v1483_v55, %v1329_v10  ;;  %v774_v55 = vadd.f32 %v772_v61, %v752_v38 }
  0xf4   :  { %v335_v31 = vmul.f32 %v1737_v14, %v319_v42 }
  0xf5   :  { %v779_v36 = vpop.permute.xlu1 %778  ;;  %v777_v39 = vpop.permute.xlu0 %776  ;;  %v336_v5 = vadd.f32 %v334_v0, %v313_v6 }
  0xf6   :  { %v780_v60 = vsel %vm111_vm1, %v777_v39, %v779_v36  ;;  %v781_v48 = vsel %vm111_vm1, %v779_v36, %v777_v39  ;;  %v1741_v36 = vrot.slane %v1473_v50, %v1331_v12  ;;  %v337_v30 = vadd.f32 %v335_v31, %v314_v22  ;;  %v408_v22 = vld [vmem:[#allocation2 + $0x16] ss:$8 sm:$0x3] }
  0xf7   :  { %v794_v19 = vmul.f32 %v1740_v44, %v781_v48 }
  0xf8   :  { %v795_v45 = vmul.f32 %v1741_v36, %v780_v60 }
  0xf9   :  { %v341_v43 = vpop.permute.xlu1 %340  ;;  %v339_v16 = vpop.permute.xlu0 %338  ;;  %v796_v17 = vadd.f32 %v794_v19, %v774_v55 }
  0xfa   :  { %v342_v7 = vsel %vm135_vm3, %v339_v16, %v341_v43  ;;  %v343_v54 = vsel %vm135_vm3, %v341_v43, %v339_v16  ;;  %v1744_v43 = vrot.slane %v1511_v34, %v1331_v12  ;;  %v797_v49 = vadd.f32 %v795_v45, %v775_v4 }
  0xfb   :  { %v357_v23 = vmul.f32 %v1738_v35, %v343_v54  ;;  %v358_v9 = vmul.f32 %v1739_v33, %v342_v7  ;;  %v1745_v34 = vrot.slane %v1513_v18, %v1329_v10  ;;  %v1746_v54 = vrot.slane %v1513_v18, %v1331_v12  ;;  %v864_v35 = vld [vmem:[#allocation2 + $0x16] ss:$8 sm:$0x3] }
  0xfc   :  { %v869_v44 = vrot.slane %v864_v35, %v1329_v10  ;;  %v873_v19 = vrot.slane %v864_v35, %v1331_v12 }
  0xfd   :  { %v801_v32 = vpop.permute.xlu1 %800  ;;  %v799_v37 = vpop.permute.xlu0 %798  ;;  %v359_v28 = vadd.f32 %v357_v23, %v336_v5  ;;  %v360_v41 = vadd.f32 %v358_v9, %v337_v30  ;;  %v431_v23 = vld [vmem:[#allocation2 + $0x17] ss:$8 sm:$0x3]  ;;  %v413_v9 = vrot.slane %v408_v22, %v1329_v10 }
  0xfe   :  { %v802_v3 = vsel %vm135_vm3, %v799_v37, %v801_v32  ;;  %v803_v39 = vsel %vm135_vm3, %v801_v32, %v799_v37  ;;  %v436_v36 = vrot.slane %v431_v23, %v1329_v10  ;;  %v440_v45 = vrot.slane %v431_v23, %v1331_v12 }
  0xff   :  { %v816_v47 = vmul.f32 %v1742_v26, %v803_v39  ;;  %v817_v11 = vmul.f32 %v1743_v40, %v802_v3 }
 0x101   :  { %v364_v58 = vpop.permute.xlu1 %363  ;;  %v362_v59 = vpop.permute.xlu0 %361  ;;  %v818_v57 = vadd.f32 %v816_v47, %v796_v17  ;;  %v819_v61 = vadd.f32 %v817_v11, %v797_v49 }
 0x102   :  { %v365_v50 = vsel %vm159_vm4, %v362_v59, %v364_v58  ;;  %v366_v27 = vsel %vm159_vm4, %v364_v58, %v362_v59 }
 0x103   :  { %v380_v8 = vmul.f32 %v373_v20, %v366_v27  ;;  %v381_v16 = vmul.f32 %v1744_v43, %v365_v50  ;;  %v459_v50 = vrot.slane %v454_v46, %v1329_v10  ;;  %v463_v27 = vrot.slane %v454_v46, %v1331_v12 }
 0x105   :  { %v382_v56 = vadd.f32 %v380_v8, %v359_v28  ;;  %v383_v42 = vadd.f32 %v381_v16, %v360_v41  ;;  %v823_v51 = vpop.permute.xlu1 %822  ;;  %v821_v52 = vpop.permute.xlu0 %820  ;;  %v913_v28 = vrot.slane %v908_v29, %v1329_v10  ;;  %v917_v41 = vrot.slane %v908_v29, %v1331_v12  ;;  %v477_v8 = vld [vmem:[#allocation2 + $0x21] ss:$8 sm:$0x3] }
 0x106   :  { %v824_v53 = vsel %vm159_vm4, %v821_v52, %v823_v51  ;;  %v825_v20 = vsel %vm159_vm4, %v823_v51, %v821_v52 }
 0x107   :  { %v838_v7 = vmul.f32 %v1745_v34, %v825_v20  ;;  %v839_v0 = vmul.f32 %v1746_v54, %v824_v53  ;;  %v399_v63 = vadd.f32 %v1556_v24, %v382_v56  ;;  %v400_v62 = vadd.f32 %v1559_v25, %v383_v42  ;;  %v886_v25 = vld [vmem:[#allocation2 + $0x17] ss:$8 sm:$0x3] }
 0x108   :  { %v417_v24 = vrot.slane %v408_v22, %v1331_v12  ;;  %v891_v5 = vrot.slane %v886_v25, %v1329_v10  ;;  %v895_v30 = vrot.slane %v886_v25, %v1331_v12  ;;  %v482_v20 = vrot.slane %v477_v8, %v1329_v10 }
 0x109   :  { %v840_v14 = vadd.f32 %v838_v7, %v818_v57  ;;  %v841_v31 = vadd.f32 %v839_v0, %v819_v61  ;;  %v404_v60 = vpop.permute.xlu1 %403  ;;  %v402_v48 = vpop.permute.xlu0 %401  ;;  %v930_v57 = vld [vmem:[#allocation2 + $0x21] ss:$8 sm:$0x3]  ;;  %v486_v34 = vrot.slane %v477_v8, %v1331_v12 }
 0x10a   :  { %v405_v3 = vsel %vm200_vm5, %v402_v48, %v404_v60  ;;  %v406_v39 = vsel %vm200_vm5, %v404_v60, %v402_v48  ;;  %v935_v48 = vrot.slane %v930_v57, %v1329_v10 }
 0x10b   :  { %v856_v32 = vadd.f32 %v854_v13, %v840_v14  ;;  %v857_v37 = vadd.f32 %v855_v15, %v841_v31  ;;  %v420_v26 = vmul.f32 %v413_v9, %v405_v3  ;;  %v421_v47 = vmul.f32 %v417_v24, %v406_v39 }
 0x10d   :  { %v861_v21 = vpop.permute.xlu1 %860  ;;  %v859_v38 = vpop.permute.xlu0 %858  ;;  %v422_v61 = vadd.f32 %v420_v26, %v399_v63  ;;  %v423_v53 = vadd.f32 %v421_v47, %v400_v62 }
 0x10e   :  { %v862_v55 = vsel %vm200_vm5, %v859_v38, %v861_v21  ;;  %v863_v4 = vsel %vm200_vm5, %v861_v21, %v859_v38  ;;  %v939_v21 = vrot.slane %v930_v57, %v1331_v12 }
 0x10f   :  { %v876_v43 = vmul.f32 %v869_v44, %v862_v55  ;;  %v877_v16 = vmul.f32 %v873_v19, %v863_v4 }
 0x111   :  { %v427_v2 = vpop.permute.xlu1 %426  ;;  %v425_v6 = vpop.permute.xlu0 %424  ;;  %v878_v63 = vadd.f32 %v876_v43, %v856_v32  ;;  %v879_v62 = vadd.f32 %v877_v16, %v857_v37 }
 0x112   :  { %v428_v40 = vsel %vm224_vm6, %v425_v6, %v427_v2  ;;  %v429_v11 = vsel %vm224_vm6, %v427_v2, %v425_v6 }
 0x113   :  { %v443_v56 = vmul.f32 %v436_v36, %v428_v40  ;;  %v444_v42 = vmul.f32 %v440_v45, %v429_v11 }
 0x115   :  { %v883_v33 = vpop.permute.xlu1 %882  ;;  %v881_v18 = vpop.permute.xlu0 %880  ;;  %v445_v38 = vadd.f32 %v443_v56, %v422_v61  ;;  %v446_v2 = vadd.f32 %v444_v42, %v423_v53  ;;  %v1031_v53 = vld [vmem:[#allocation5 + $0x8] sm:$0xff] }
 0x116   :  { %v884_v51 = vsel %vm224_vm6, %v881_v18, %v883_v33  ;;  %v885_v52 = vsel %vm224_vm6, %v883_v33, %v881_v18 }
 0x117   :  { %v898_v31 = vmul.f32 %v891_v5, %v884_v51  ;;  %v899_v60 = vmul.f32 %v895_v30, %v885_v52 }
 0x119   :  { %v450_v58 = vpop.permute.xlu1 %449  ;;  %v448_v59 = vpop.permute.xlu0 %447  ;;  %v900_v39 = vadd.f32 %v898_v31, %v878_v63  ;;  %v901_v12 = vadd.f32 %v899_v60, %v879_v62 }
 0x11a   :  { %v451_v17 = vsel %vm248_vm7, %v448_v59, %v450_v58  ;;  %v452_v49 = vsel %vm248_vm7, %v450_v58, %v448_v59 }
 0x11b   :  { %v466_v7 = vmul.f32 %v459_v50, %v451_v17  ;;  %v467_v54 = vmul.f32 %v463_v27, %v452_v49 }
 0x11d   :  { %v905_v13 = vpop.permute.xlu1 %904  ;;  %v903_v15 = vpop.permute.xlu0 %902  ;;  %v468_v9 = vadd.f32 %v466_v7, %v445_v38  ;;  %v469_v24 = vadd.f32 %v467_v54, %v446_v2 }
 0x11e   :  { %v906_v0 = vsel %vm248_vm7, %v903_v15, %v905_v13  ;;  %v907_v14 = vsel %vm248_vm7, %v905_v13, %v903_v15  ;;  %v1030_v13 = vld [vmem:[#allocation5] sm:$0xff] }
 0x11f   :  { %v920_v35 = vmul.f32 %v913_v28, %v906_v0  ;;  %v921_v23 = vmul.f32 %v917_v41, %v907_v14 }
 0x121   :  { %v473_v6 = vpop.permute.xlu1 %472  ;;  %v471_v22 = vpop.permute.xlu0 %470  ;;  %v922_v36 = vadd.f32 %v920_v35, %v900_v39  ;;  %v923_v45 = vadd.f32 %v921_v23, %v901_v12 }
 0x122   :  { %v474_v33 = vsel %vm272_vm8, %v471_v22, %v473_v6  ;;  %v475_v18 = vsel %vm272_vm8, %v473_v6, %v471_v22 }
 0x123   :  { %v489_v25 = vmul.f32 %v482_v20, %v474_v33  ;;  %v490_v3 = vmul.f32 %v486_v34, %v475_v18 }
 0x125   :  { %v491_v32 = vadd.f32 %v489_v25, %v468_v9  ;;  %v492_v37 = vadd.f32 %v490_v3, %v469_v24  ;;  %v927_v44 = vpop.permute.xlu1 %926  ;;  %v925_v19 = vpop.permute.xlu0 %924 }
 0x126   :  { %v928_v46 = vsel %vm272_vm8, %v925_v19, %v927_v44  ;;  %v929_v29 = vsel %vm272_vm8, %v927_v44, %v925_v19 }
 0x127   :  { %v994_v55 = vmul.f32 -1.442695, %v491_v32  ;;  %v995_v4 = vmul.f32 -1.442695, %v492_v37  ;;  %v942_v5 = vmul.f32 %v935_v48, %v928_v46  ;;  %v943_v30 = vmul.f32 %v939_v21, %v929_v29 }
 0x129   :  { %1014 = vpow2.f32 %v994_v55  ;;  %v944_v58 = vadd.f32 %v942_v5, %v922_v36  ;;  %v945_v59 = vadd.f32 %v943_v30, %v923_v45 }
 0x12a   :  { %1016 = vpow2.f32 %v995_v4 }
 0x12b   :  { %v996_v26 = vmul.f32 -1.442695, %v944_v58  ;;  %v997_v47 = vmul.f32 -1.442695, %v945_v59 }
 0x12d   :  { %1018 = vpow2.f32 %v996_v26 }
 0x12e   :  { %1020 = vpow2.f32 %v997_v47 }
 0x133   :  { %v1015_v40 = vpop.eup %1014 }
 0x134   :  { %v1017_v11 = vpop.eup %1016  ;;  %v499_v50 = vadd.f32 1.0, %v1015_v40 }
 0x135   :  { %v500_v27 = vadd.f32 1.0, %v1017_v11 }
 0x136   :  { %1022 = vrcp.f32 %v499_v50 }
 0x137   :  { %v1019_v28 = vpop.eup %1018  ;;  %1024 = vrcp.f32 %v500_v27 }
 0x138   :  { %v1021_v1 = vpop.eup %1020  ;;  %v952_v41 = vadd.f32 1.0, %v1019_v28 }
 0x139   :  { %v953_v8 = vadd.f32 1.0, %v1021_v1 }
 0x13a   :  { %1026 = vrcp.f32 %v952_v41 }
 0x13b   :  { %1028 = vrcp.f32 %v953_v8 }
 0x140   :  { %v1023_v43 = vpop.eup %1022 }
 0x141   :  { %v1025_v16 = vpop.eup %1024  ;;  %v508_v17 = vrot.slane %v1023_v43, %v1329_v10 }
 0x142   :  { %v512_v49 = vrot.slane %v1025_v16, %v1329_v10 }
 0x144   :  { %v1027_v56 = vpop.eup %1026  ;;  %v515_v42 = vcombine.low %v508_v17, %v512_v49 }
 0x145   :  { %v1029_v51 = vpop.eup %1028  ;;  %v961_v52 = vrot.slane %v1027_v56, %v1329_v10 }
 0x146   :  { %v517_v15 = vmul.f32 %v1030_v13, %v515_v42  ;;  %v965_v57 = vrot.slane %v1029_v51, %v1329_v10 }
 0x148   :  { %520 = vst [vmem:[#allocation7] sm:$0xff] %v517_v15  ;;  %v968_v61 = vcombine.low %v961_v52, %v965_v57 }
 0x14a   :  { %v970_v20 = vmul.f32 %v1031_v53, %v968_v61 }
 0x14c   :  { %973 = vst [vmem:[#allocation7 + $0x8] sm:$0xff] %v970_v20 }
 0x14d   :  { %1087 = shalt.err (!%p1084_p6)
}
 0x14e   :  { %s1088_s19 = scalar_lea.hbm %s1736_s2, 256 }
 0x14f   :  { %p1089_p7 = scmp.ne.s32.totalorder %s1736_s2, %s1088_s19  ;;  %p1092_p8 = scmp.lt.u32.totalorder %s1088_s19, %s1736_s2 }
 0x151   :  { %p1094_p9 = pnand %p1092_p8, %p1089_p7 }
 0x153   :  { %1097 = shalt.err (!%p1094_p9)
}
 0x154   :  { %985 = dma.vmem_to_hbm [thread:$0]  %s980_s15, 256, %s1736_s2, [#allocation4], %s1108_s0, %s1108_s0, %s1109_s5  }
 0x155   :  { %1102 = dma.done.wait [#allocation4], 256  }
 0x156   :  { %1103 = vsyncadd [#allocation4], 4294967040 }
 0x157   :  { %989 = vsyncpa [#allocation3], 1 }
 0x158   :  { %990 = vsyncpa [#allocation6], 1 }
 0x159   :  { %991 = vsyncpa [#allocation4], 1 }

</bundles_post_ra>
